<compile_context>
chip_gen: v7x
topology: tpu7x:2x2x1
jax: 0.10.0
libtpu: 0.0.40
codegen_flags: <defaults>
</compile_context>

<pallas_src>
import functools

import jax
import jax.numpy as jnp
from jax.experimental import pallas as pl
from jax.experimental.pallas import tpu as pltpu


def _round_up(x: int, m: int) -> int:
    return (x + m - 1) // m * m


def _cdiv(a: int, b: int) -> int:
    return (a + b - 1) // b


def _select_batch_tiling(batch: int, tile_b_max: int):
    """Balanced batch tiling.

    Fewest tiles of size <= tile_b_max, rounded up to an EVEN tile count (so
    the 'parallel' grid axis always splits across v7x's two TensorCores), each
    tile rounded up to the 8-row sublane rule.  Worst-case padding is
    ~8*num_tiles rows rather than up to tile_b-1 rows.
    """
    tile_b_max = max(8, tile_b_max)
    num_tiles = max(1, _cdiv(batch, tile_b_max))
    if num_tiles % 2:
        num_tiles += 1
    tb = _round_up(_cdiv(batch, num_tiles), 8)
    return tb, num_tiles, tb * num_tiles


def _critic_kernel(s_ref, a_ref, w1s_ref, w1a_ref, b1_ref, w2_ref, b2_ref,
                   w3_ref, b3_ref, o_ref):
    # Layer 1 (concat-free): (TB, S) @ (S, H) + (TB, A) @ (A, H) + b1
    h1 = (jnp.dot(s_ref[...], w1s_ref[...], preferred_element_type=jnp.float32)
          + jnp.dot(a_ref[...], w1a_ref[...], preferred_element_type=jnp.float32)
          + b1_ref[...])
    h1 = jnp.maximum(h1, 0.0)                                        # ReLU
    # Layer 2: (TB, H) @ (H, H) + b2
    h2 = jnp.dot(h1.astype(w2_ref.dtype), w2_ref[...],
                 preferred_element_type=jnp.float32) + b2_ref[...]
    h2 = jnp.maximum(h2, 0.0)                                        # ReLU
    # Head: q[0, i] = sum_j h2[i, j] * w3[0, j].  Computed as w3 @ h2^T on the
    # MXU (same contraction pattern as flash-attention q.k^T), so the result is
    # produced lane-major as (1, TB): full-width stores + lane-dense output DMA.
    q_row = jax.lax.dot_general(
        w3_ref[...], h2.astype(w3_ref.dtype),
        dimension_numbers=(((1,), (1,)), ((), ())),
        preferred_element_type=jnp.float32) + b3_ref[0]              # (1, TB)
    o_ref[0] = q_row.astype(o_ref.dtype)


@functools.partial(jax.jit, static_argnames=("tile_b",))
def critic_forward(state, action, params, *, tile_b=2048):
    """state: (B, state_dim), action: (B, action_dim) -> Q-values (B, 1).

    Keep tile_b <= 4096 under the default 32 MiB scoped-VMEM limit (the
    relevant headroom check is v7x, whose physical VMEM is 64 MiB).
    """
    w1_s, w1_a, b1, w2, b2, w3, b3 = params
    B, S = state.shape
    A = action.shape[1]
    H = w2.shape[0]
    cdt = w2.dtype  # matmul-operand dtype (bf16 by default)

    tb, num_tiles, padded_b = _select_batch_tiling(B, tile_b)
    if padded_b != B:
        pad = padded_b - B
        state = jnp.pad(state, ((0, pad), (0, 0)))
        action = jnp.pad(action, ((0, pad), (0, 0)))
    state = state.astype(cdt)
    action = action.astype(cdt)

    flops = 2 * padded_b * ((S + A) * H + H * H + H)
    bytes_accessed = (
        state.size * state.dtype.itemsize
        + action.size * action.dtype.itemsize
        + sum(int(p.size) * p.dtype.itemsize for p in params)
        + padded_b * 4)

    out = pl.pallas_call(
        _critic_kernel,
        # Lane-dense output slab: one (1, tb) row per grid step.
        out_shape=jax.ShapeDtypeStruct((num_tiles, 1, tb), jnp.float32),
        grid=(num_tiles,),
        in_specs=[
            pl.BlockSpec((tb, S), lambda i: (i, 0)),             # state tile
            pl.BlockSpec((tb, A), lambda i: (i, 0)),             # action tile
            pl.BlockSpec((S, H), lambda i: (0, 0)),              # W1_s (resident)
            pl.BlockSpec((A, H), lambda i: (0, 0)),              # W1_a (resident)
            pl.BlockSpec((1, H), lambda i: (0, 0)),              # b1
            pl.BlockSpec((H, H), lambda i: (0, 0)),              # W2   (resident)
            pl.BlockSpec((1, H), lambda i: (0, 0)),              # b2
            pl.BlockSpec((1, H), lambda i: (0, 0)),              # W3 row
            pl.BlockSpec(memory_space=pltpu.MemorySpace.SMEM),   # b3 (1,) scalar
        ],
        out_specs=pl.BlockSpec((1, 1, tb), lambda i: (i, 0, 0)),
        compiler_params=pltpu.CompilerParams(
            dimension_semantics=("parallel",),
            vmem_limit_bytes=32 * 1024 * 1024),
        cost_estimate=pl.CostEstimate(
            flops=flops, transcendentals=0, bytes_accessed=bytes_accessed),
    )(state, action, w1_s, w1_a, b1, w2, b2, w3, b3)

    # (num_tiles, 1, tb) -> (padded_b, 1); drop the padded batch rows.
    return out.reshape(padded_b, 1)[:B]


def init_critic_params(key, state_dim, action_dim, hidden_dim=256,
                       compute_dtype=jnp.bfloat16):
    """Xavier-uniform weights, zero biases (matches _init_weights).

    Weights are stored as (in, out) so the kernel computes x @ W; W1 is
    pre-split into its state/action row blocks; matmul weights are bf16.
    Note: keep hidden_dim a multiple of 256 in production configs (default 256)
    so the (H, H) layer-2 matmul maps to whole 256x256 MXU passes on v6e/v7x
    (granule is 128 on v5e); other values waste MXU cycles on padded passes.
    """
    def xavier(k, fan_in, fan_out, shape):
        bound = float(jnp.sqrt(6.0 / (fan_in + fan_out)))
        return jax.random.uniform(k, shape, jnp.float32, -bound, bound)

    k1, k2, k3 = jax.random.split(key, 3)
    in_dim = state_dim + action_dim
    w1 = xavier(k1, in_dim, hidden_dim, (in_dim, hidden_dim))
    w1_s = w1[:state_dim].astype(compute_dtype)          # (S, H)
    w1_a = w1[state_dim:].astype(compute_dtype)          # (A, H)
    b1 = jnp.zeros((1, hidden_dim), jnp.float32)
    w2 = xavier(k2, hidden_dim, hidden_dim,
                (hidden_dim, hidden_dim)).astype(compute_dtype)   # (H, H)
    b2 = jnp.zeros((1, hidden_dim), jnp.float32)
    w3 = xavier(k3, hidden_dim, 1, (1, hidden_dim)).astype(compute_dtype)  # (1, H)
    b3 = jnp.zeros((1,), jnp.float32)                    # 1-D scalar for SMEM
    return (w1_s, w1_a, b1, w2, b2, w3, b3)


if __name__ == "__main__":
    # Small shapes consistent with the module's forward signature.
    batch, state_dim, action_dim, hidden_dim = 8, 16, 8, 32

    key = jax.random.PRNGKey(0)
    k_state, k_action, k_params = jax.random.split(key, 3)

    state = jax.random.normal(k_state, (batch, state_dim), jnp.float32)
    action = jax.random.normal(k_action, (batch, action_dim), jnp.float32)
    params = init_critic_params(k_params, state_dim, action_dim, hidden_dim)

    q = critic_forward(state, action, params)
    jax.block_until_ready(q)

    # Pure-JAX reference applying the identical bf16-operand / f32-accum math.
    w1_s, w1_a, b1, w2, b2, w3, b3 = params
    s16 = state.astype(w1_s.dtype)
    a16 = action.astype(w1_a.dtype)
    h1 = jnp.maximum(
        jnp.dot(s16, w1_s, preferred_element_type=jnp.float32)
        + jnp.dot(a16, w1_a, preferred_element_type=jnp.float32) + b1, 0.0)
    h2 = jnp.maximum(
        jnp.dot(h1.astype(w2.dtype), w2,
                preferred_element_type=jnp.float32) + b2, 0.0)
    q_row = jax.lax.dot_general(
        w3, h2.astype(w3.dtype),
        dimension_numbers=(((1,), (1,)), ((), ())),
        preferred_element_type=jnp.float32)
    ref = q_row[0][:, None] + b3[0]

    assert q.shape == (batch, 1), q.shape
    assert jnp.allclose(q, ref, atol=1e-3, rtol=1e-3), float(
        jnp.max(jnp.abs(q - ref)))
    print("KERNEL_OK")
</pallas_src>

<mosaic_0001>
module attributes {stable_mosaic.version = 11 : i64} {
  func.func @_critic_kernel(%arg0: i32, %arg1: memref<8x16xbf16, #tpu.memory_space<vmem>>, %arg2: memref<8x8xbf16, #tpu.memory_space<vmem>>, %arg3: memref<16x32xbf16, #tpu.memory_space<vmem>>, %arg4: memref<8x32xbf16, #tpu.memory_space<vmem>>, %arg5: memref<1x32xf32, #tpu.memory_space<vmem>>, %arg6: memref<32x32xbf16, #tpu.memory_space<vmem>>, %arg7: memref<1x32xf32, #tpu.memory_space<vmem>>, %arg8: memref<1x32xbf16, #tpu.memory_space<vmem>>, %arg9: memref<1xf32, #tpu.memory_space<smem>>, %arg10: memref<1x1x8xf32, #tpu.memory_space<vmem>>) attributes {dimension_semantics = [#tpu.dimension_semantics<parallel>], iteration_bounds = array<i64: 2>, scalar_prefetch = 0 : i64, scratch_operands = 0 : i64, tpu.core_type = #tpu.core_type<tc>, window_params = [{transform_indices = @transform_0, window_bounds = array<i64: 8, 16>}, {transform_indices = @transform_1, window_bounds = array<i64: 8, 8>}, {pipeline_mode = #tpu.pipeline_mode<synchronous>, transform_indices = @transform_2, window_bounds = array<i64: 16, 32>}, {pipeline_mode = #tpu.pipeline_mode<synchronous>, transform_indices = @transform_3, window_bounds = array<i64: 8, 32>}, {pipeline_mode = #tpu.pipeline_mode<synchronous>, transform_indices = @transform_4, window_bounds = array<i64: 1, 32>}, {pipeline_mode = #tpu.pipeline_mode<synchronous>, transform_indices = @transform_5, window_bounds = array<i64: 32, 32>}, {pipeline_mode = #tpu.pipeline_mode<synchronous>, transform_indices = @transform_6, window_bounds = array<i64: 1, 32>}, {pipeline_mode = #tpu.pipeline_mode<synchronous>, transform_indices = @transform_7, window_bounds = array<i64: 1, 32>}, {transform_indices = @transform_8, window_bounds = array<i64: 1>}, {transform_indices = @transform_9, window_bounds = array<i64: 1, 1, 8>}]} {
    %c0 = arith.constant 0 : index
    %c0_0 = arith.constant 0 : index
    %0 = vector.load %arg1[%c0, %c0_0] : memref<8x16xbf16, #tpu.memory_space<vmem>>, vector<8x16xbf16>
    %c0_1 = arith.constant 0 : index
    %c0_2 = arith.constant 0 : index
    %1 = vector.load %arg3[%c0_1, %c0_2] : memref<16x32xbf16, #tpu.memory_space<vmem>>, vector<16x32xbf16>
    %cst = arith.constant dense<0.000000e+00> : vector<8x32xf32>
    %2 = tpu.matmul %0, %1, %cst {dimension_numbers = #tpu.dot_dimension_numbers<[1], [0], [0], [1], [0, 0, 1, 1], [], []>} : vector<8x16xbf16>, vector<16x32xbf16>, vector<8x32xf32> -> vector<8x32xf32>
    %c0_3 = arith.constant 0 : index
    %c0_4 = arith.constant 0 : index
    %3 = vector.load %arg2[%c0_3, %c0_4] : memref<8x8xbf16, #tpu.memory_space<vmem>>, vector<8x8xbf16>
    %c0_5 = arith.constant 0 : index
    %c0_6 = arith.constant 0 : index
    %4 = vector.load %arg4[%c0_5, %c0_6] : memref<8x32xbf16, #tpu.memory_space<vmem>>, vector<8x32xbf16>
    %cst_7 = arith.constant dense<0.000000e+00> : vector<8x32xf32>
    %5 = tpu.matmul %3, %4, %cst_7 {dimension_numbers = #tpu.dot_dimension_numbers<[1], [0], [0], [1], [0, 0, 1, 1], [], []>} : vector<8x8xbf16>, vector<8x32xbf16>, vector<8x32xf32> -> vector<8x32xf32>
    %6 = arith.addf %2, %5 : vector<8x32xf32>
    %c0_8 = arith.constant 0 : index
    %c0_9 = arith.constant 0 : index
    %7 = vector.load %arg5[%c0_8, %c0_9] : memref<1x32xf32, #tpu.memory_space<vmem>>, vector<1x32xf32>
    %8 = vector.broadcast %7 : vector<1x32xf32> to vector<8x32xf32>
    %9 = arith.addf %6, %8 : vector<8x32xf32>
    %cst_10 = arith.constant 0.000000e+00 : f32
    %10 = vector.broadcast %cst_10 : f32 to vector<8x32xf32>
    %11 = arith.maximumf %9, %10 : vector<8x32xf32>
    %12 = arith.truncf %11 : vector<8x32xf32> to vector<8x32xbf16>
    %c0_11 = arith.constant 0 : index
    %c0_12 = arith.constant 0 : index
    %13 = vector.load %arg6[%c0_11, %c0_12] : memref<32x32xbf16, #tpu.memory_space<vmem>>, vector<32x32xbf16>
    %cst_13 = arith.constant dense<0.000000e+00> : vector<8x32xf32>
    %14 = tpu.matmul %12, %13, %cst_13 {dimension_numbers = #tpu.dot_dimension_numbers<[1], [0], [0], [1], [0, 0, 1, 1], [], []>} : vector<8x32xbf16>, vector<32x32xbf16>, vector<8x32xf32> -> vector<8x32xf32>
    %c0_14 = arith.constant 0 : index
    %c0_15 = arith.constant 0 : index
    %15 = vector.load %arg7[%c0_14, %c0_15] : memref<1x32xf32, #tpu.memory_space<vmem>>, vector<1x32xf32>
    %16 = vector.broadcast %15 : vector<1x32xf32> to vector<8x32xf32>
    %17 = arith.addf %14, %16 : vector<8x32xf32>
    %cst_16 = arith.constant 0.000000e+00 : f32
    %18 = vector.broadcast %cst_16 : f32 to vector<8x32xf32>
    %19 = arith.maximumf %17, %18 : vector<8x32xf32>
    %c0_17 = arith.constant 0 : index
    %c0_18 = arith.constant 0 : index
    %20 = vector.load %arg8[%c0_17, %c0_18] : memref<1x32xbf16, #tpu.memory_space<vmem>>, vector<1x32xbf16>
    %21 = arith.truncf %19 : vector<8x32xf32> to vector<8x32xbf16>
    %cst_19 = arith.constant dense<0.000000e+00> : vector<1x8xf32>
    %22 = tpu.matmul %20, %21, %cst_19 {dimension_numbers = #tpu.dot_dimension_numbers<[1], [1], [0], [0], [0, 0, 1, 0], [], []>} : vector<1x32xbf16>, vector<8x32xbf16>, vector<1x8xf32> -> vector<1x8xf32>
    %c0_20 = arith.constant 0 : index
    %23 = memref.load %arg9[%c0_20] : memref<1xf32, #tpu.memory_space<smem>>
    %24 = vector.broadcast %23 : f32 to vector<1x8xf32>
    %25 = arith.addf %22, %24 : vector<1x8xf32>
    %c0_21 = arith.constant 0 : index
    %c0_22 = arith.constant 0 : index
    %c0_23 = arith.constant 0 : index
    %26 = vector.load %arg10[%c0_21, %c0_22, %c0_23] : memref<1x1x8xf32, #tpu.memory_space<vmem>>, vector<1x1x8xf32>
    %27 = vector.shape_cast %26 : vector<1x1x8xf32> to vector<1x8xf32>
    %28 = vector.shape_cast %25 : vector<1x8xf32> to vector<1x1x8xf32>
    tpu.vector_store %arg10[%c0_21, %c0_22, %c0_23], %28 {strides = array<i32>} : memref<1x1x8xf32, #tpu.memory_space<vmem>>, vector<1x1x8xf32>,
    return
  }
  func.func @transform_0(%arg0: i32) -> (i32, i32) {
    %c0_i32 = arith.constant 0 : i32
    %c0_i32_0 = arith.constant 0 : i32
    return %arg0, %c0_i32 : i32, i32
  }
  func.func @transform_1(%arg0: i32) -> (i32, i32) {
    %c0_i32 = arith.constant 0 : i32
    %c0_i32_0 = arith.constant 0 : i32
    return %arg0, %c0_i32 : i32, i32
  }
  func.func @transform_2(%arg0: i32) -> (i32, i32) {
    %c0_i32 = arith.constant 0 : i32
    %c0_i32_0 = arith.constant 0 : i32
    %c0_i32_1 = arith.constant 0 : i32
    return %c0_i32, %c0_i32_0 : i32, i32
  }
  func.func @transform_3(%arg0: i32) -> (i32, i32) {
    %c0_i32 = arith.constant 0 : i32
    %c0_i32_0 = arith.constant 0 : i32
    %c0_i32_1 = arith.constant 0 : i32
    return %c0_i32, %c0_i32_0 : i32, i32
  }
  func.func @transform_4(%arg0: i32) -> (i32, i32) {
    %c0_i32 = arith.constant 0 : i32
    %c0_i32_0 = arith.constant 0 : i32
    %c0_i32_1 = arith.constant 0 : i32
    return %c0_i32, %c0_i32_0 : i32, i32
  }
  func.func @transform_5(%arg0: i32) -> (i32, i32) {
    %c0_i32 = arith.constant 0 : i32
    %c0_i32_0 = arith.constant 0 : i32
    %c0_i32_1 = arith.constant 0 : i32
    return %c0_i32, %c0_i32_0 : i32, i32
  }
  func.func @transform_6(%arg0: i32) -> (i32, i32) {
    %c0_i32 = arith.constant 0 : i32
    %c0_i32_0 = arith.constant 0 : i32
    %c0_i32_1 = arith.constant 0 : i32
    return %c0_i32, %c0_i32_0 : i32, i32
  }
  func.func @transform_7(%arg0: i32) -> (i32, i32) {
    %c0_i32 = arith.constant 0 : i32
    %c0_i32_0 = arith.constant 0 : i32
    %c0_i32_1 = arith.constant 0 : i32
    return %c0_i32, %c0_i32_0 : i32, i32
  }
  func.func @transform_8(%arg0: i32) -> i32 {
    %c0_i32 = arith.constant 0 : i32
    %c0_i32_0 = arith.constant 0 : i32
    return %c0_i32 : i32
  }
  func.func @transform_9(%arg0: i32) -> (i32, i32, i32) {
    %c0_i32 = arith.constant 0 : i32
    %c0_i32_0 = arith.constant 0 : i32
    %c0_i32_1 = arith.constant 0 : i32
    return %arg0, %c0_i32, %c0_i32_0 : i32, i32, i32
  }
}

</mosaic_0001>

<bundles_post_ra>
// kernel: critic_forward.1
= control target key start
LH: loop header
LB: loop body
LE: loop exit
PB: predicated region body
PF: predicated region fallthrough
CT: control target
= control target key end

     0   :  { %s766_s11 = smov 0   ;;  %s815_s0 = inlined_call_operand.vmem [shape: bf16[16,16], index: 0, kind: input, shape index: {}]   ;;  %s816_s1 = inlined_call_operand.vmem [shape: bf16[16,8], index: 1, kind: input, shape index: {}]   ;;  %s817_s2 = inlined_call_operand.vmem [shape: bf16[16,32], index: 2, kind: input, shape index: {}]   ;;  %s818_s3 = inlined_call_operand.vmem [shape: bf16[8,32], index: 3, kind: input, shape index: {}]   ;;  %s819_s4 = inlined_call_operand.vmem [shape: f32[1,32], index: 4, kind: input, shape index: {}]   ;;  %s820_s5 = inlined_call_operand.vmem [shape: bf16[32,32], index: 5, kind: input, shape index: {}]   ;;  %s821_s6 = inlined_call_operand.vmem [shape: f32[1,32], index: 6, kind: input, shape index: {}]   ;;  %s822_s7 = inlined_call_operand.vmem [shape: bf16[1,32], index: 7, kind: input, shape index: {}]   ;;  %s823_s8 = inlined_call_operand.<no memory space> [shape: f32[1], index: 8, kind: input, shape index: {}]   ;;  %s824_s9 = inlined_call_operand.vmem [shape: f32[2,1,8], index: 9, kind: output, shape index: {}]  }
   0x1   :  { %14 = sst [smem:[#allocation2]] %s823_s8 }
   0x2 LB: > { %s637_s12 = sadd.s32 4294967295, %s709_s11   ;;  %p641_p0 = scmp.ge.s32.totalorder %s709_s11, 1  ;;  %s709_s11 = sphi %s766_s11, %s20_s11  }
   0x3   : > { %p296_p1 = scmp.lt.s32.totalorder %s709_s11, 3 }
   0x5   : > { %p297_p2 = pnand %p641_p0, %p296_p1 }
   0x6   : > { %v349_v0 = vld [vmem:[%s818_s3] sm:$0xf] (!%p297_p2)  ;;  %vm354_vm0 = vcmask (!%p297_p2), 1043456   ;;  %v711_v1 = vmov (!%p297_p2), 0.0   ;;  %p333_p3 = scmp.lt.s32.totalorder (!%p297_p2), %s637_s12, 1  ;;  %vm712_vm1 = vmmov (!%p297_p2), 0  }
   0x7   : > { %300 = sbr.rel (%p297_p2) target bundleno = 680 (0x2a8), region = 56  ;;  %664 = vmatprep.subr.bf16.mxu0 (!%p297_p2), %v711_v1  ;;  %670 = vmatprep.subr.bf16.mxu1 (!%p297_p2), %v711_v1  ;;  %v356_v2 = vsel (!%p297_p2), %vm354_vm0, %v349_v0, 0  ;;  %v700_v3 = vld [vmem:[%s817_s2] sm:$0xff] (!%p297_p2)   ;;  %vm350_vm2 = vcmask (!%p297_p2), 64512   ;;  %vm404_vm3 = vcmask (!%p297_p2), 130048   ;;  %v702_v7 = vld [vmem:[%s820_s5 + $0x8] sm:$0xff] (!%p297_p2)  }
   0x8   : > { %665 = vmatpush3.bf16.msra.mxu0 (!%p297_p2), %v356_v2  ;;  %666 = vmatprep.mubr.msk.bf16.mxu0 (!%p297_p2), %vm712_vm1, %v711_v1  ;;  %v701_v6 = vld [vmem:[%s820_s5] sm:$0xff] (!%p297_p2)   ;;  %vm481_vm4 = vcmask (!%p297_p2), 261120   ;;  %s528_s14 = sld [smem:[#allocation2]] (!%p297_p2)  ;;  %vm576_vm5 = vcmask (!%p297_p2), 57344  }
   0x9   : > { %671 = vmatpush3.bf16.msra.mxu1 (!%p297_p2), %v700_v3  ;;  %672 = vmatprep.mubr.msk.bf16.mxu1 (!%p297_p2), %vm712_vm1, %v711_v1  ;;  %v647_v10 = vld [vmem:[%s819_s4] ss:$0 sm:$0xff] (!%p297_p2) }
   0xa   : > { %676 = vmatprep.subr.bf16.mxu0 (!%p297_p2), %v711_v1  ;;  %684 = vmatprep.subr.bf16.mxu1 (!%p297_p2), %v711_v1  ;;  %v648_v21 = vld [vmem:[%s821_s6] ss:$0 sm:$0xff] (!%p297_p2) }
   0xb   : > { %v526_v30 = vld [vmem:[%s822_s7] sm:$0x1] (!%p297_p2) }
   0xe   : > { %s826_s12 = smov (!%p333_p3, %s637_s12), 1  ;;  %v529_v31 = vstv %s528_s14 }
   0xf   : > { %s642_s16 = sshll.u32 %s826_s12, 2 }
  0x10   : > { %s340_s19 = scalar_lea.vmem %s816_s1, %s642_s16  ;;  %s336_s22 = scalar_lea.vmem %s815_s0, %s642_s16 }
  0x11   : > { %v348_v4 = vld [vmem:[%s340_s19] sm:$0xf]  ;;  %s343_s16 = scalar_lea.vmem %s824_s9, %s826_s12 }
  0x12   : > { %v345_v5 = vld [vmem:[%s336_s22] sm:$0xf]  ;;  %667 = vmatmul.mubr.msk.bf16.vlgmr.msra.gmra.mrb[0].mxu0 %vm350_vm2, %v348_v4 }
  0x13   : > { %673 = vmatmul.mubr.msk.bf16.vlgmr.msra.gmra.mrb[0].mxu1 %vm404_vm3, %v345_v5  ;;  %680 = vmatprep.mubr.msk.bf16.mxu0 %vm712_vm1, %v711_v1 }
  0x14   : > { %686 = vmatprep.mubr.msk.bf16.mxu1 %vm712_vm1, %v711_v1  ;;  %677 = vmatpush3.bf16.msra.mxu0 %v701_v6 }
  0x15   : > { %678 = vmatprep.subr.bf16.mxu0 %v711_v1 }
  0x18   : > { %679 = vmatpush3.bf16.msra.mxu0 %v702_v7 }
  0xe5   : > { %v392_v8 = vpop.f32.mrb[0].mxu0 }
  0xe6   : > { %v442_v9 = vpop.f32.mrb[0].mxu1  ;;  %v668_v12 = vpop.f32.mrb[1].mxu0 }
  0xe7   : > { %v443_v11 = vadd.f32 %v442_v9, %v392_v8  ;;  %v674_v13 = vpop.f32.mrb[1].mxu1  ;;  %v395_v14 = vpop.f32.mrb[2].mxu0 }
  0xe8   : > { %v445_v15 = vpop.f32.mrb[2].mxu1  ;;  %v669_v17 = vpop.f32.mrb[3].mxu0 }
  0xe9   : > { %v455_v16 = vadd.f32 %v647_v10, %v443_v11  ;;  %v675_v18 = vpop.f32.mrb[3].mxu1 }
  0xeb   : > { %v456_v19 = vmax.f32 %v455_v16, 0.0 }
  0xed   : > { %v457_v20 = vpack.c.bf16 %v456_v19, %v456_v19 }
  0xef   : > { %681 = vmatmul.mubr.msk.bf16.vlgmr.msra.gmra.mrb[4].mxu0 %vm481_vm4, %v457_v20 }
 0x1c2   : > { %v519_v22 = vpop.f32.mrb[4].mxu0 }
 0x1c3   : > { %v520_v23 = vadd.f32 %v648_v21, %v519_v22  ;;  %v682_v24 = vpop.f32.mrb[5].mxu0 }
 0x1c4   : > { %v522_v25 = vpop.f32.mrb[6].mxu0 }
 0x1c5   : > { %v525_v26 = vmax.f32 %v520_v23, 0.0  ;;  %v683_v27 = vpop.f32.mrb[7].mxu0 }
 0x1c7   : > { %v527_v28 = vpack.c.bf16 %v525_v26, %v525_v26 }
 0x1c9   : > { %v534_v29 = vsel %vm481_vm4, %v527_v28, 0 }
 0x1ca   : > { %685 = vmatpush3.bf16.xpose.msra.mxu1 %v534_v29 }
 0x1d1   : > { %687 = vmatmul.mubr.msk.bf16.vlgmr.msra.gmra.mrb[4].mxu1 %vm481_vm4, %v526_v30 }
 0x2a4   : > { %v570_v32 = vpop.f32.mrb[4].mxu1 }
 0x2a5   : > { %v571_v33 = vadd.f32 %v570_v32, %v529_v31  ;;  %v688_v34 = vpop.f32.mrb[5].mxu1 }
 0x2a6   : > { %v573_v35 = vpop.f32.mrb[6].mxu1 }
 0x2a7   : > { %577 = vst.msk [vmem:[%s343_s16] sm:$0x1] %vm576_vm5, %v571_v33  ;;  %v689_v36 = vpop.f32.mrb[7].mxu1 }
 0x2a8 PF: > { %s20_s11 = sadd.s32 1, %s709_s11  }
 0x2a9   : > { %p17_p4 = scmp.ge.s32.totalorder %s20_s11, 4  }
 0x2ab   :  { %19 = sbr.rel (!%p17_p4) target bundleno = 2 (0x2), region = 89 }

</bundles_post_ra>
